<compile_context>
chip_gen: v5e
topology: v5e:2x2
jax: 0.10.0
libtpu: 0.0.40
codegen_flags: <defaults>
</compile_context>

<pallas_src>
import math

import jax
import jax.numpy as jnp
from jax.experimental import pallas as pl
from jax.experimental.pallas import tpu as pltpu


# ----------------------------------------------------------------------------
# helpers
# ----------------------------------------------------------------------------
def _pick_tile(dim, prefs):
    """Largest preferred tile that evenly divides `dim`, else the full dim."""
    for p in prefs:
        if dim % p == 0:
            return p
    return dim


# ----------------------------------------------------------------------------
# tiled linear:  y = x @ W + b
# ----------------------------------------------------------------------------
def linear_kernel(x_ref, w_ref, b_ref, o_ref, acc_ref):
    # grid = (M/tm, N/tn, K/tk); K (reduction) is the last axis.
    @pl.when(pl.program_id(2) == 0)
    def _init():
        acc_ref[...] = jnp.zeros_like(acc_ref)

    acc_ref[...] += jnp.dot(
        x_ref[...], w_ref[...], preferred_element_type=jnp.float32)

    @pl.when(pl.program_id(2) == pl.num_programs(2) - 1)
    def _finalize():
        o_ref[...] = (acc_ref[...] + b_ref[...].astype(jnp.float32)
                      ).astype(o_ref.dtype)


def linear(x2d, w, b):
    M, K = x2d.shape
    K2, N = w.shape
    assert K == K2
    # Tile sizes sized against the smallest VMEM (v7x: 64 MiB physical,
    # 32 MiB scoped default): double-buffered x/w/b + out + acc stays < 8 MiB.
    tm = _pick_tile(M, (256, 128, 64, 32, 16, 8))
    tn = _pick_tile(N, (512, 256, 128))
    tk = _pick_tile(K, (512, 256, 128))
    b2d = b.reshape(1, N)
    grid = (M // tm, N // tn, K // tk)
    return pl.pallas_call(
        linear_kernel,
        out_shape=jax.ShapeDtypeStruct((M, N), x2d.dtype),
        grid_spec=pltpu.PrefetchScalarGridSpec(
            num_scalar_prefetch=0,
            grid=grid,
            in_specs=[
                pl.BlockSpec((tm, tk), lambda i, j, k: (i, k)),
                pl.BlockSpec((tk, tn), lambda i, j, k: (k, j)),
                pl.BlockSpec((1, tn), lambda i, j, k: (0, j)),
            ],
            out_specs=pl.BlockSpec((tm, tn), lambda i, j, k: (i, j)),
            scratch_shapes=[pltpu.VMEM((tm, tn), jnp.float32)],
        ),
        compiler_params=pltpu.CompilerParams(
            dimension_semantics=("parallel", "parallel", "arbitrary")),
    )(x2d, w, b2d)


# ----------------------------------------------------------------------------
# flash-style causal attention over qkv laid out as [B, S, 3, H, D]
# ----------------------------------------------------------------------------
def attn_kernel(q_ref, k_ref, v_ref, o_ref, m_sc, l_sc, acc_sc):
    # q_ref: (tq, H, D), k_ref/v_ref: (tk, H, D), o_ref: (tq, H, D)
    tq, H, D = q_ref.shape
    tk = k_ref.shape[0]
    scale = 1.0 / math.sqrt(D)

    qi = pl.program_id(1)
    ki = pl.program_id(2)
    nk = pl.num_programs(2)
    q_start = qi * tq
    kv_start = ki * tk

    @pl.when(ki == 0)
    def _init():
        m_sc[...] = jnp.full_like(m_sc, -jnp.inf)
        l_sc[...] = jnp.zeros_like(l_sc)
        acc_sc[...] = jnp.zeros_like(acc_sc)

    def compute(apply_mask):
        if apply_mask:
            row = q_start + jax.lax.broadcasted_iota(jnp.int32, (tq, tk), 0)
            col = kv_start + jax.lax.broadcasted_iota(jnp.int32, (tq, tk), 1)
            causal = row >= col
        # Static unrolled loop over heads: amortizes per-grid-step overhead
        # when D < 128 and keeps all matmuls as plain 2-D MXU ops.
        for h in range(H):
            q = q_ref[:, h, :] * scale          # fold 1/sqrt(D) into q tile
            k = k_ref[:, h, :]
            v = v_ref[:, h, :]
            # scores = q @ k^T without an explicit transpose (contract last
            # dim of both operands) -> (tq, tk), f32 accumulation on MXU.
            s = jax.lax.dot_general(
                q, k, dimension_numbers=(((1,), (1,)), ((), ())),
                preferred_element_type=jnp.float32)
            if apply_mask:
                s = jnp.where(causal, s, -1e30)
            m_prev = m_sc[h]                                  # (tq, 1)
            m_new = jnp.maximum(m_prev, jnp.max(s, axis=-1, keepdims=True))
            alpha = jnp.exp(m_prev - m_new)
            p = jnp.exp(s - m_new)
            l_sc[h] = alpha * l_sc[h] + jnp.sum(p, axis=-1, keepdims=True)
            acc_sc[h] = alpha * acc_sc[h] + jnp.dot(
                p.astype(v.dtype), v, preferred_element_type=jnp.float32)
            m_sc[h] = m_new

    # Block-causal scheduling: skip fully-masked (upper-triangle) blocks,
    # apply the in-block mask only on blocks that straddle the diagonal.
    @pl.when(kv_start + tk - 1 <= q_start)
    def _full_block():
        compute(False)

    @pl.when(jnp.logical_and(kv_start + tk - 1 > q_start,
                             kv_start <= q_start + tq - 1))
    def _diag_block():
        compute(True)

    @pl.when(ki == nk - 1)
    def _finalize():
        for h in range(H):
            inv = pl.reciprocal(l_sc[h], approx=True)         # EUP slot
            o_ref[:, h, :] = (acc_sc[h] * inv).astype(o_ref.dtype)


def flash_causal_attention(qkv, num_heads):
    # qkv: [B, S, 3, H, D]  (a free reshape of the c_attn output)
    B, S, three, H, D = qkv.shape
    assert three == 3 and H == num_heads
    tq = _pick_tile(S, (128,))
    tk = _pick_tile(S, (128,))
    grid = (B, S // tq, S // tk)
    return pl.pallas_call(
        attn_kernel,
        out_shape=jax.ShapeDtypeStruct((B, S, H, D), qkv.dtype),
        grid_spec=pltpu.PrefetchScalarGridSpec(
            num_scalar_prefetch=0,
            grid=grid,
            in_specs=[
                # q / k / v tiles gathered straight out of the packed qkv
                # tensor by the DMA engine (no HBM transpose in the wrapper).
                pl.BlockSpec((None, tq, None, H, D),
                             lambda b, qi, ki: (b, qi, 0, 0, 0)),
                pl.BlockSpec((None, tk, None, H, D),
                             lambda b, qi, ki: (b, ki, 1, 0, 0)),
                pl.BlockSpec((None, tk, None, H, D),
                             lambda b, qi, ki: (b, ki, 2, 0, 0)),
            ],
            out_specs=pl.BlockSpec((None, tq, H, D),
                                   lambda b, qi, ki: (b, qi, 0, 0)),
            scratch_shapes=[
                pltpu.VMEM((H, tq, 1), jnp.float32),   # running max m
                pltpu.VMEM((H, tq, 1), jnp.float32),   # running sum l
                pltpu.VMEM((H, tq, D), jnp.float32),   # running output acc
            ],
        ),
        compiler_params=pltpu.CompilerParams(
            dimension_semantics=("parallel", "parallel", "arbitrary")),
    )(qkv, qkv, qkv)


# ----------------------------------------------------------------------------
# SequenceParallel(GPT2Attention) forward, world_size = 1
# ----------------------------------------------------------------------------
class SequenceParallelGPT2Attention:
    def __init__(self, embed_dim, num_heads, key):
        assert embed_dim % num_heads == 0
        self.embed_dim = embed_dim
        self.num_heads = num_heads
        self.head_dim = embed_dim // num_heads
        self.split_size = embed_dim
        k1, k2, k3, k4 = jax.random.split(key, 4)
        # GPT-2 Conv1D weights: c_attn.weight [E, 3E], c_proj.weight [E, E]
        self.c_attn_w = 0.02 * jax.random.normal(k1, (embed_dim, 3 * embed_dim),
                                                 jnp.float32)
        self.c_attn_b = 0.02 * jax.random.normal(k2, (3 * embed_dim,), jnp.float32)
        self.c_proj_w = 0.02 * jax.random.normal(k3, (embed_dim, embed_dim),
                                                 jnp.float32)
        self.c_proj_b = 0.02 * jax.random.normal(k4, (embed_dim,), jnp.float32)

    def __call__(self, hidden_states):
        B, S, E = hidden_states.shape
        H, D = self.num_heads, self.head_dim

        # rotation_generate with world_size==1 => plain c_attn projection.
        x2d = hidden_states.reshape(B * S, E)
        qkv = linear(x2d, self.c_attn_w, self.c_attn_b)       # [B*S, 3E]
        # Free reshape only; head split is done by BlockSpec index_maps.
        qkv = qkv.reshape(B, S, 3, H, D)

        attn = flash_causal_attention(qkv, H)                 # [B, S, H, D]

        # Head merge is a free reshape (output already written as [B,S,H,D]).
        out = linear(attn.reshape(B * S, E), self.c_proj_w, self.c_proj_b)
        # reduce-scatter + resid_dropout are identity at world_size==1 / eval.
        return out.reshape(B, S, E)


# ----------------------------------------------------------------------------
# pure-JAX reference for a sanity check
# ----------------------------------------------------------------------------
def reference_forward(mod, x):
    B, S, E = x.shape
    H, D = mod.num_heads, mod.head_dim
    qkv = x.reshape(B * S, E) @ mod.c_attn_w + mod.c_attn_b
    q, k, v = jnp.split(qkv.reshape(B, S, 3 * E), 3, axis=2)

    def sh(t):
        return t.reshape(B, S, H, D).transpose(0, 2, 1, 3)

    q, k, v = sh(q), sh(k), sh(v)
    s = jnp.einsum("bhqd,bhkd->bhqk", q, k) / math.sqrt(D)
    mask = jnp.tril(jnp.ones((S, S), bool))
    s = jnp.where(mask, s, jnp.finfo(jnp.float32).min)
    p = jax.nn.softmax(s, axis=-1)
    o = jnp.einsum("bhqk,bhkd->bhqd", p, v)
    o = o.transpose(0, 2, 1, 3).reshape(B, S, E)
    return (o.reshape(B * S, E) @ mod.c_proj_w + mod.c_proj_b).reshape(B, S, E)


if __name__ == "__main__":
    B, S, E, H = 2, 8, 32, 4
    key = jax.random.PRNGKey(0)
    kx, kp = jax.random.split(key)

    mod = SequenceParallelGPT2Attention(embed_dim=E, num_heads=H, key=kp)
    x = jax.random.normal(kx, (B, S, E), jnp.float32)

    out = mod(x)
    out = jax.block_until_ready(out)

    ref = reference_forward(mod, x)
    assert out.shape == (B, S, E)
    # slightly relaxed tolerance: softmax denominator uses the approximate
    # (EUP) reciprocal inside the kernel.
    assert jnp.allclose(out, ref, atol=2e-3, rtol=2e-2)

    print("KERNEL_OK")
</pallas_src>

<mosaic_0001>
module attributes {stable_mosaic.version = 11 : i64} {
  func.func @linear_kernel(%arg0: i32, %arg1: i32, %arg2: i32, %arg3: memref<16x32xf32, #tpu.memory_space<vmem>>, %arg4: memref<32x96xf32, #tpu.memory_space<vmem>>, %arg5: memref<1x96xf32, #tpu.memory_space<vmem>>, %arg6: memref<16x96xf32, #tpu.memory_space<vmem>>, %arg7: memref<16x96xf32, #tpu.memory_space<vmem>>) attributes {dimension_semantics = [#tpu.dimension_semantics<parallel>, #tpu.dimension_semantics<parallel>, #tpu.dimension_semantics<arbitrary>], iteration_bounds = array<i64: 1, 1, 1>, scalar_prefetch = 0 : i64, scratch_operands = 1 : i64, tpu.core_type = #tpu.core_type<tc>, window_params = [{transform_indices = @transform_0, window_bounds = array<i64: 16, 32>}, {transform_indices = @transform_1, window_bounds = array<i64: 32, 96>}, {transform_indices = @transform_2, window_bounds = array<i64: 1, 96>}, {transform_indices = @transform_3, window_bounds = array<i64: 16, 96>}]} {
    %c0_i32 = arith.constant 0 : i32
    %0 = arith.cmpi eq, %arg2, %c0_i32 : i32
    %1 = arith.extui %0 : i1 to i32
    %c0_i32_0 = arith.constant 0 : i32
    %2 = arith.cmpi ne, %1, %c0_i32_0 : i32
    scf.if %2 {
      %cst_10 = arith.constant 0.000000e+00 : f32
      %12 = vector.broadcast %cst_10 : f32 to vector<16x96xf32>
      %c0_11 = arith.constant 0 : index
      %c0_12 = arith.constant 0 : index
      %13 = vector.load %arg7[%c0_11, %c0_12] : memref<16x96xf32, #tpu.memory_space<vmem>>, vector<16x96xf32>
      tpu.vector_store %arg7[%c0_11, %c0_12], %12 {strides = array<i32>} : memref<16x96xf32, #tpu.memory_space<vmem>>, vector<16x96xf32>,
    } else {
    }
    %c0 = arith.constant 0 : index
    %c0_1 = arith.constant 0 : index
    %3 = vector.load %arg7[%c0, %c0_1] : memref<16x96xf32, #tpu.memory_space<vmem>>, vector<16x96xf32>
    %c0_2 = arith.constant 0 : index
    %c0_3 = arith.constant 0 : index
    %4 = vector.load %arg3[%c0_2, %c0_3] : memref<16x32xf32, #tpu.memory_space<vmem>>, vector<16x32xf32>
    %c0_4 = arith.constant 0 : index
    %c0_5 = arith.constant 0 : index
    %5 = vector.load %arg4[%c0_4, %c0_5] : memref<32x96xf32, #tpu.memory_space<vmem>>, vector<32x96xf32>
    %cst = arith.constant dense<0.000000e+00> : vector<16x96xf32>
    %6 = tpu.matmul %4, %5, %cst {dimension_numbers = #tpu.dot_dimension_numbers<[1], [0], [0], [1], [0, 0, 1, 1], [], []>} : vector<16x32xf32>, vector<32x96xf32>, vector<16x96xf32> -> vector<16x96xf32>
    %7 = arith.addf %3, %6 : vector<16x96xf32>
    %c0_6 = arith.constant 0 : index
    %c0_7 = arith.constant 0 : index
    %8 = vector.load %arg7[%c0_6, %c0_7] : memref<16x96xf32, #tpu.memory_space<vmem>>, vector<16x96xf32>
    tpu.vector_store %arg7[%c0_6, %c0_7], %7 {strides = array<i32>} : memref<16x96xf32, #tpu.memory_space<vmem>>, vector<16x96xf32>,
    %c0_i32_8 = arith.constant 0 : i32
    %9 = arith.cmpi eq, %arg2, %c0_i32_8 : i32
    %10 = arith.extui %9 : i1 to i32
    %c0_i32_9 = arith.constant 0 : i32
    %11 = arith.cmpi ne, %10, %c0_i32_9 : i32
    scf.if %11 {
      %c0_10 = arith.constant 0 : index
      %c0_11 = arith.constant 0 : index
      %12 = vector.load %arg7[%c0_10, %c0_11] : memref<16x96xf32, #tpu.memory_space<vmem>>, vector<16x96xf32>
      %c0_12 = arith.constant 0 : index
      %c0_13 = arith.constant 0 : index
      %13 = vector.load %arg5[%c0_12, %c0_13] : memref<1x96xf32, #tpu.memory_space<vmem>>, vector<1x96xf32>
      %14 = vector.broadcast %13 : vector<1x96xf32> to vector<16x96xf32>
      %15 = arith.addf %12, %14 : vector<16x96xf32>
      %c0_14 = arith.constant 0 : index
      %c0_15 = arith.constant 0 : index
      %16 = vector.load %arg6[%c0_14, %c0_15] : memref<16x96xf32, #tpu.memory_space<vmem>>, vector<16x96xf32>
      tpu.vector_store %arg6[%c0_14, %c0_15], %15 {strides = array<i32>} : memref<16x96xf32, #tpu.memory_space<vmem>>, vector<16x96xf32>,
    } else {
    }
    return
  }
  func.func @transform_0(%arg0: i32, %arg1: i32, %arg2: i32) -> (i32, i32) {
    %c0_i32 = arith.constant 0 : i32
    return %arg0, %arg2 : i32, i32
  }
  func.func @transform_1(%arg0: i32, %arg1: i32, %arg2: i32) -> (i32, i32) {
    %c0_i32 = arith.constant 0 : i32
    return %arg2, %arg1 : i32, i32
  }
  func.func @transform_2(%arg0: i32, %arg1: i32, %arg2: i32) -> (i32, i32) {
    %c0_i32 = arith.constant 0 : i32
    %c0_i32_0 = arith.constant 0 : i32
    return %c0_i32, %arg1 : i32, i32
  }
  func.func @transform_3(%arg0: i32, %arg1: i32, %arg2: i32) -> (i32, i32) {
    %c0_i32 = arith.constant 0 : i32
    return %arg0, %arg1 : i32, i32
  }
}

</mosaic_0001>

<bundles_post_ra>
// kernel: tpu_custom_call.1
= control target key start
LH: loop header
LB: loop body
LE: loop exit
PB: predicated region body
PF: predicated region fallthrough
CT: control target
= control target key end

     0   :  { %8 = vsyncpa [#allocation4], 0  ;;  %s274_s0 = inlined_call_operand.hbm [shape: f32[16,32], index: 0, kind: input, shape index: {}]   ;;  %s275_s1 = inlined_call_operand.hbm [shape: f32[32,96], index: 1, kind: input, shape index: {}]   ;;  %s276_s2 = inlined_call_operand.vmem [shape: f32[1,96], index: 2, kind: input, shape index: {}]   ;;  %s277_s3 = inlined_call_operand.hbm [shape: f32[16,96], index: 3, kind: output, shape index: {}]  }
   0x1   :  { %9 = vsyncpa [#allocation7], 0 }
   0x2   :  { %10 = vsyncpa [#allocation5], 0  ;;  %s15_s14 = sshll.u32 %s274_s0, 4  ;;  %s221_s15 = smov [#allocation3]   ;;  %s16_s14 = int_to_ptr.hbm [resolvable:$true] %s15_s14 }
   0x3   :  { %s17_s16 = sshll.u32 %s221_s15, 4  ;;  %s28_s19 = sshll.u32 %s275_s1, 4  ;;  %s18_s16 = int_to_ptr.vmem [resolvable:$true] %s17_s16  ;;  %s29_s19 = int_to_ptr.hbm [resolvable:$true] %s28_s19 }
   0x4   :  { %s222_s20 = smov 128   ;;  %s223_s21 = smov 8  }
   0x5   :  { %23 = dma.hbm_to_vmem [thread:$0]  %s16_s14, 256, %s18_s16, [#allocation4], %s222_s20, %s222_s20, %s223_s21  }
   0x6   :  { %s224_s22 = smov [#allocation6]  }
   0x7   :  { %s30_s23 = sshll.u32 %s224_s22, 4  ;;  %s31_s23 = int_to_ptr.vmem [resolvable:$true] %s30_s23 }
   0x8   :  { %36 = dma.hbm_to_vmem [thread:$0]  %s29_s19, 512, %s31_s23, [#allocation7], %s222_s20, %s222_s20, %s223_s21  }
   0x9   :  { %215 = dma.done.wait [#allocation4], 256  }
   0xa   :  { %216 = vsyncadd [#allocation4], 4294967040 }
   0xb   :  { %217 = dma.done.wait [#allocation7], 512  }
   0xc   :  { %218 = vsyncadd [#allocation7], 4294966784  ;;  %vm51_vm0 = vcmask 785408   ;;  %v225_v0 = vmov 0.0   ;;  %v61_v1 = vld [vmem:[#allocation6 + $0x18] sm:$0xff]  ;;  %v60_v2 = vld [vmem:[#allocation6 + $0x10] sm:$0xff] }
   0xd   :  { %52 = vst.msk [vmem:[#allocation2] sm:$0xff] %vm51_vm0, %v225_v0  ;;  %81 = vmatpush.msra.mxu0 %v61_v1  ;;  %132 = vmatpush.msra.mxu1 %v61_v1  ;;  %v59_v3 = vld [vmem:[#allocation6 + $0x8] sm:$0xff]  ;;  %v58_v4 = vld [vmem:[#allocation6] sm:$0xff]  ;;  %v56_v5 = vld [vmem:[#allocation3] sm:$0xff]  ;;  %vm62_vm1 = vcmask 261120   ;;  %s226_s24 = smov [#allocation8]  }
   0xe   :  { %53 = vst.msk [vmem:[#allocation2 + $0x8] sm:$0xff] %vm51_vm0, %v225_v0  ;;  %v57_v6 = vld [vmem:[#allocation3 + $0x8] sm:$0xff]  ;;  %v142_v13 = vld [vmem:[%s276_s2] ss:$0 sm:$0xff]  ;;  %s114_s25 = sshll.u32 %s226_s24, 4  ;;  %s116_s28 = sshll.u32 %s277_s3, 4  ;;  %s115_s25 = int_to_ptr.vmem [resolvable:$true] %s114_s25  ;;  %s117_s28 = int_to_ptr.hbm [resolvable:$true] %s116_s28 }
   0xf   :  { %82 = vmatpush.msra.mxu0 %v60_v2  ;;  %133 = vmatpush.msra.mxu1 %v60_v2 }
  0x11   :  { %83 = vmatpush.msra.mxu0 %v59_v3  ;;  %134 = vmatpush.msra.mxu1 %v59_v3 }
  0x13   :  { %84 = vmatpush.msra.mxu0 %v58_v4  ;;  %135 = vmatpush.msra.mxu1 %v58_v4 }
  0x14   :  { %130 = vmatmul.msk.f32.vlgmr.msra.gmra.mxu0 %vm62_vm1, %v56_v5  ;;  %131 = vmatmul.msk.f32.vlgmr.msra.gmra.mxu1 %vm62_vm1, %v57_v6  ;;  %v54_v7 = vld [vmem:[#allocation2] sm:$0xff] }
  0x15   :  { %v55_v8 = vld [vmem:[#allocation2 + $0x8] sm:$0xff] }
  0x91   :  { %v86_v9 = vpop.f32.mrf.mxu0  ;;  %v89_v10 = vpop.f32.mrf.mxu1 }
  0x92   :  { %v92_v11 = vadd.f32 %v86_v9, %v54_v7  ;;  %v93_v12 = vadd.f32 %v89_v10, %v55_v8 }
  0x94   :  { %95 = vst.msk [vmem:[#allocation2] sm:$0xff] %vm51_vm0, %v92_v11 }
  0x95   :  { %96 = vst.msk [vmem:[#allocation2 + $0x8] sm:$0xff] %vm51_vm0, %v93_v12 }
  0x9b   :  { %v100_v14 = vld [vmem:[#allocation2] sm:$0xff] }
  0x9c   :  { %v101_v15 = vld [vmem:[#allocation2 + $0x8] sm:$0xff]  ;;  %v106_v16 = vadd.f32 %v142_v13, %v100_v14 }
  0x9d   :  { %v107_v17 = vadd.f32 %v142_v13, %v101_v15 }
  0x9e   :  { %108 = vst.msk [vmem:[#allocation8] sm:$0xff] %vm51_vm0, %v106_v16 }
  0x9f   :  { %109 = vst.msk [vmem:[#allocation8 + $0x8] sm:$0xff] %vm51_vm0, %v107_v17 }
  0xa0   :  { %122 = dma.vmem_to_hbm [thread:$0]  %s115_s25, 256, %s117_s28, [#allocation5], %s222_s20, %s222_s20, %s223_s21  }
  0xa1   :  { %219 = dma.done.wait [#allocation5], 256  }
  0xa2   :  { %220 = vsyncadd [#allocation5], 4294967040 }
  0xa3   :  { %127 = vsyncpa [#allocation4], 1 }
  0xa4   :  { %128 = vsyncpa [#allocation7], 1 }
  0xa5   :  { %129 = vsyncpa [#allocation5], 1 }

</bundles_post_ra>
